<compile_context>
chip_gen: v5e
topology: v5e:2x2
jax: 0.10.0
libtpu: 0.0.40
codegen_flags: <defaults>
</compile_context>

<pallas_src>
import functools

import jax
import jax.numpy as jnp
from jax import lax
from jax.experimental import pallas as pl
from jax.experimental.pallas import tpu as pltpu


def channel_attention_kernel(hw_total, tile_hw, needs_mask,
                             x_ref, w1t_ref, w2t_ref, o_ref,
                             sum_acc, max_acc):
    # x_ref:   (tile_b, C, tile_hw)  native dtype, streamed
    # w1t_ref: (C, Ch)               resident (Ch = C // 16)
    # w2t_ref: (Ch, C)               resident
    # o_ref:   (1, tile_b, C)        written on the final spatial step
    # sum_acc/max_acc: (tile_b, C)   float32 VMEM scratch accumulators
    s = pl.program_id(1)
    n_s = pl.num_programs(1)

    @pl.when(s == 0)
    def _init():
        sum_acc[...] = jnp.zeros_like(sum_acc)
        max_acc[...] = jnp.full_like(max_acc, -jnp.inf)

    x = x_ref[...]  # keep native dtype; upcast folds into the f32 reduce

    if needs_mask:
        # Steady state: full tiles -> no iota / where / extra copies.
        @pl.when(s < n_s - 1)
        def _full():
            sum_acc[...] += jnp.sum(x, axis=-1, dtype=jnp.float32)
            max_acc[...] = jnp.maximum(max_acc[...],
                                       jnp.max(x, axis=-1).astype(jnp.float32))

        # Final (partial) tile: mask padded lanes strictly BEFORE any arithmetic.
        @pl.when(s == n_s - 1)
        def _tail():
            start = s * tile_hw
            lane = lax.broadcasted_iota(jnp.int32, (1, 1, tile_hw), 2) + start
            valid = lane < hw_total
            xf = x.astype(jnp.float32)
            x_sum = jnp.where(valid, xf, 0.0)
            x_max = jnp.where(valid, xf, -jnp.inf)
            sum_acc[...] += jnp.sum(x_sum, axis=-1)
            max_acc[...] = jnp.maximum(max_acc[...], jnp.max(x_max, axis=-1))
    else:
        sum_acc[...] += jnp.sum(x, axis=-1, dtype=jnp.float32)
        max_acc[...] = jnp.maximum(max_acc[...],
                                   jnp.max(x, axis=-1).astype(jnp.float32))

    @pl.when(s == n_s - 1)
    def _finalize():
        tb = sum_acc.shape[0]
        avg = sum_acc[...] * (1.0 / hw_total)                  # true-HW mean
        mx = max_acc[...]
        # Batch the two FC branches into one matmul pair: (2*tile_b, C).
        stacked = jnp.concatenate([avg, mx], axis=0)
        w1t = w1t_ref[...].astype(jnp.float32)                 # (C, Ch)
        w2t = w2t_ref[...].astype(jnp.float32)                 # (Ch, C)
        h = jnp.maximum(
            jnp.dot(stacked, w1t, preferred_element_type=jnp.float32), 0.0)
        y = jnp.dot(h, w2t, preferred_element_type=jnp.float32)  # (2*tb, C)
        out = y[:tb] + y[tb:]
        o_ref[...] = jax.nn.sigmoid(out)[None].astype(o_ref.dtype)


def _vmem_capacity_bytes():
    """Per-core VMEM capacity, chip-aware with safe fallbacks."""
    try:
        return int(pltpu.get_tpu_info().vmem_capacity_bytes)
    except Exception:
        pass
    try:
        kind = jax.devices()[0].device_kind.lower()
    except Exception:
        kind = ""
    if any(t in kind for t in ("v4", "v5", "v6")):
        return 128 << 20
    return 64 << 20  # v7x and unknown generations: be conservative


def _pick_tile_b(B):
    """min(B, 8), but keep >= 2 batch tiles when B >= 2 (megacore), and divide B."""
    cap = min(8, B)
    if B >= 2:
        cap = min(cap, max(1, B // 2))
    for tb in range(cap, 0, -1):
        if B % tb == 0:
            return tb
    return 1


def _pick_tile_hw(C, HW, itemsize, tile_b, buffers, budget_bytes):
    """Largest multiple-of-128 spatial tile whose multi-buffered x block fits
    the chip-aware VMEM budget; falls back to the full HW (always legal)."""
    per_lane = max(buffers * tile_b * C * itemsize, 1)
    tile = (budget_bytes // per_lane) // 128 * 128
    tile = max(int(tile), 128)
    if tile >= HW:
        return HW
    return int(tile)


def channel_attention(x_nchw, w1, w2, *, tile_hw=None, tile_b=None, buffers=2):
    """x_nchw: (B, C, H, W); w1: (C//16, C); w2: (C, C//16).

    Returns (B, C, 1, 1) in the input dtype (matches the PyTorch module)."""
    B, C, H, W = x_nchw.shape
    Ch = w1.shape[0]
    HW = H * W

    vmem_cap = _vmem_capacity_bytes()
    x_budget = (vmem_cap * 3) // 8      # streamed-x multi-buffer budget
    vmem_limit = (vmem_cap * 3) // 4    # scoped-VMEM ceiling handed to Mosaic

    if tile_b is None:
        tile_b = _pick_tile_b(B)
    assert B % tile_b == 0

    x_flat = x_nchw.reshape(B, C, HW)   # keep native dtype on the wire
    w1t = jnp.transpose(w1)             # (C, Ch)
    w2t = jnp.transpose(w2)             # (Ch, C)

    if tile_hw is None:
        tile_hw = _pick_tile_hw(C, HW, x_flat.dtype.itemsize,
                                tile_b, buffers, x_budget)
    else:
        # Sanitize user-provided tiles: multiple of 128 or the full extent.
        tile_hw = HW if tile_hw >= HW else max(128, (tile_hw // 128) * 128)

    n_b = B // tile_b
    n_s = pl.cdiv(HW, tile_hw)
    needs_mask = (HW % tile_hw) != 0

    kernel = functools.partial(channel_attention_kernel, HW, tile_hw, needs_mask)

    if buffers != 2:
        x_spec = pl.BlockSpec((tile_b, C, tile_hw), lambda b, s: (b, 0, s),
                              pipeline_mode=pl.Buffered(buffers))
    else:
        x_spec = pl.BlockSpec((tile_b, C, tile_hw), lambda b, s: (b, 0, s))

    cost = pl.CostEstimate(
        flops=int(2 * B * C * HW + 8 * B * C * Ch),
        transcendentals=int(B * C),
        bytes_accessed=int(x_flat.size * x_flat.dtype.itemsize
                           + (w1t.size + w2t.size) * w1t.dtype.itemsize
                           + B * C * x_nchw.dtype.itemsize),
    )

    out = pl.pallas_call(
        kernel,
        out_shape=jax.ShapeDtypeStruct((n_b, tile_b, C), x_nchw.dtype),
        grid_spec=pltpu.PrefetchScalarGridSpec(
            num_scalar_prefetch=0,
            grid=(n_b, n_s),
            in_specs=[
                x_spec,
                pl.BlockSpec((C, Ch), lambda b, s: (0, 0)),   # weights resident
                pl.BlockSpec((Ch, C), lambda b, s: (0, 0)),
            ],
            out_specs=pl.BlockSpec((1, tile_b, C), lambda b, s: (b, 0, 0)),
            scratch_shapes=[
                pltpu.VMEM((tile_b, C), jnp.float32),   # running sum
                pltpu.VMEM((tile_b, C), jnp.float32),   # running max
            ],
        ),
        compiler_params=pltpu.CompilerParams(
            dimension_semantics=("parallel", "arbitrary"),
            vmem_limit_bytes=int(vmem_limit),
        ),
        cost_estimate=cost,
    )(x_flat, w1t, w2t)

    return out.reshape(B, C, 1, 1)


def _reference(x_nchw, w1, w2):
    # Pure-JAX reference mirroring the PyTorch module.
    xf = x_nchw.astype(jnp.float32)
    avg = jnp.mean(xf, axis=(2, 3))   # (B, C)
    mx = jnp.max(xf, axis=(2, 3))     # (B, C)

    def fc(v):
        h = jnp.maximum(v @ w1.astype(jnp.float32).T, 0.0)   # (B, Ch)
        return h @ w2.astype(jnp.float32).T                  # (B, C)

    B, C = avg.shape
    res = jax.nn.sigmoid(fc(avg) + fc(mx)).reshape(B, C, 1, 1)
    return res.astype(x_nchw.dtype)


if __name__ == "__main__":
    # The module uses `in_planes // 16` regardless of `ratio`, so C must be >= 16.
    B, C, H, W = 2, 64, 16, 16
    Ch = C // 16

    key = jax.random.PRNGKey(0)
    kx, k1, k2 = jax.random.split(key, 3)

    x = jax.random.normal(kx, (B, C, H, W), dtype=jnp.float32)
    # Deterministic "kaiming-ish" init for the 1x1 conv weights (bias=False).
    w1 = jax.random.normal(k1, (Ch, C), dtype=jnp.float32) * (2.0 / C) ** 0.5
    w2 = jax.random.normal(k2, (C, Ch), dtype=jnp.float32) * (2.0 / Ch) ** 0.5

    # Path 1: auto-tiled (single spatial block, no mask, tile_b keeps 2 batch tiles).
    out = jax.block_until_ready(channel_attention(x, w1, w2))
    ref = _reference(x, w1, w2)
    assert out.shape == (B, C, 1, 1)
    assert jnp.allclose(out, ref, atol=1e-5, rtol=1e-5), \
        float(jnp.max(jnp.abs(out - ref)))

    # Path 2: multi-tile + masked-tail (HW = 255 is not a multiple of tile_hw).
    x2 = jax.random.normal(kx, (B, C, 17, 15), dtype=jnp.float32)
    out2 = jax.block_until_ready(
        channel_attention(x2, w1, w2, tile_hw=128, tile_b=1))
    ref2 = _reference(x2, w1, w2)
    assert jnp.allclose(out2, ref2, atol=1e-5, rtol=1e-5), \
        float(jnp.max(jnp.abs(out2 - ref2)))

    print("KERNEL_OK")
</pallas_src>

<mosaic_0001>
module attributes {stable_mosaic.version = 11 : i64} {
  func.func @channel_attention_kernel(%arg0: i32, %arg1: i32, %arg2: memref<1x64x256xf32, #tpu.memory_space<vmem>>, %arg3: memref<64x4xf32, #tpu.memory_space<vmem>>, %arg4: memref<4x64xf32, #tpu.memory_space<vmem>>, %arg5: memref<1x1x64xf32, #tpu.memory_space<vmem>>, %arg6: memref<1x64xf32, #tpu.memory_space<vmem>>, %arg7: memref<1x64xf32, #tpu.memory_space<vmem>>) attributes {dimension_semantics = [#tpu.dimension_semantics<parallel>, #tpu.dimension_semantics<arbitrary>], iteration_bounds = array<i64: 2, 1>, scalar_prefetch = 0 : i64, scratch_operands = 2 : i64, tpu.core_type = #tpu.core_type<tc>, window_params = [{transform_indices = @transform_0, window_bounds = array<i64: 1, 64, 256>}, {pipeline_mode = #tpu.pipeline_mode<synchronous>, transform_indices = @transform_1, window_bounds = array<i64: 64, 4>}, {pipeline_mode = #tpu.pipeline_mode<synchronous>, transform_indices = @transform_2, window_bounds = array<i64: 4, 64>}, {transform_indices = @transform_3, window_bounds = array<i64: 1, 1, 64>}]} {
    %c0_i32 = arith.constant 0 : i32
    %0 = arith.cmpi eq, %arg1, %c0_i32 : i32
    %1 = arith.extui %0 : i1 to i32
    %c0_i32_0 = arith.constant 0 : i32
    %2 = arith.cmpi ne, %1, %c0_i32_0 : i32
    scf.if %2 {
      %cst_14 = arith.constant 0.000000e+00 : f32
      %15 = vector.broadcast %cst_14 : f32 to vector<1x64xf32>
      %c0_15 = arith.constant 0 : index
      %c0_16 = arith.constant 0 : index
      %16 = vector.load %arg6[%c0_15, %c0_16] : memref<1x64xf32, #tpu.memory_space<vmem>>, vector<1x64xf32>
      tpu.vector_store %arg6[%c0_15, %c0_16], %15 {strides = array<i32>} : memref<1x64xf32, #tpu.memory_space<vmem>>, vector<1x64xf32>,
      %cst_17 = arith.constant 0xFF800000 : f32
      %17 = vector.broadcast %cst_17 : f32 to vector<1x64xf32>
      %c0_18 = arith.constant 0 : index
      %c0_19 = arith.constant 0 : index
      %18 = vector.load %arg7[%c0_18, %c0_19] : memref<1x64xf32, #tpu.memory_space<vmem>>, vector<1x64xf32>
      tpu.vector_store %arg7[%c0_18, %c0_19], %17 {strides = array<i32>} : memref<1x64xf32, #tpu.memory_space<vmem>>, vector<1x64xf32>,
    } else {
    }
    %c0 = arith.constant 0 : index
    %c0_1 = arith.constant 0 : index
    %c0_2 = arith.constant 0 : index
    %3 = vector.load %arg2[%c0, %c0_1, %c0_2] : memref<1x64x256xf32, #tpu.memory_space<vmem>>, vector<1x64x256xf32>
    %c0_3 = arith.constant 0 : index
    %c0_4 = arith.constant 0 : index
    %4 = vector.load %arg6[%c0_3, %c0_4] : memref<1x64xf32, #tpu.memory_space<vmem>>, vector<1x64xf32>
    %cst = arith.constant dense<0.000000e+00> : vector<1x64xf32>
    %5 = vector.multi_reduction <add>, %3, %cst [2] : vector<1x64x256xf32> to vector<1x64xf32>
    %6 = arith.addf %4, %5 : vector<1x64xf32>
    %c0_5 = arith.constant 0 : index
    %c0_6 = arith.constant 0 : index
    %7 = vector.load %arg6[%c0_5, %c0_6] : memref<1x64xf32, #tpu.memory_space<vmem>>, vector<1x64xf32>
    tpu.vector_store %arg6[%c0_5, %c0_6], %6 {strides = array<i32>} : memref<1x64xf32, #tpu.memory_space<vmem>>, vector<1x64xf32>,
    %c0_7 = arith.constant 0 : index
    %c0_8 = arith.constant 0 : index
    %8 = vector.load %arg7[%c0_7, %c0_8] : memref<1x64xf32, #tpu.memory_space<vmem>>, vector<1x64xf32>
    %cst_9 = arith.constant dense<0xFF800000> : vector<1x64xf32>
    %9 = vector.multi_reduction <maximumf>, %3, %cst_9 [2] : vector<1x64x256xf32> to vector<1x64xf32>
    %10 = arith.maximumf %8, %9 : vector<1x64xf32>
    %c0_10 = arith.constant 0 : index
    %c0_11 = arith.constant 0 : index
    %11 = vector.load %arg7[%c0_10, %c0_11] : memref<1x64xf32, #tpu.memory_space<vmem>>, vector<1x64xf32>
    tpu.vector_store %arg7[%c0_10, %c0_11], %10 {strides = array<i32>} : memref<1x64xf32, #tpu.memory_space<vmem>>, vector<1x64xf32>,
    %c0_i32_12 = arith.constant 0 : i32
    %12 = arith.cmpi eq, %arg1, %c0_i32_12 : i32
    %13 = arith.extui %12 : i1 to i32
    %c0_i32_13 = arith.constant 0 : i32
    %14 = arith.cmpi ne, %13, %c0_i32_13 : i32
    scf.if %14 {
      %c0_14 = arith.constant 0 : index
      %c0_15 = arith.constant 0 : index
      %15 = vector.load %arg6[%c0_14, %c0_15] : memref<1x64xf32, #tpu.memory_space<vmem>>, vector<1x64xf32>
      %cst_16 = arith.constant 3.906250e-03 : f32
      %16 = vector.broadcast %cst_16 : f32 to vector<1x64xf32>
      %17 = arith.mulf %15, %16 : vector<1x64xf32>
      %c0_17 = arith.constant 0 : index
      %c0_18 = arith.constant 0 : index
      %18 = vector.load %arg7[%c0_17, %c0_18] : memref<1x64xf32, #tpu.memory_space<vmem>>, vector<1x64xf32>
      %19 = tpu.concatenate %17, %18 in 0 : vector<1x64xf32>, vector<1x64xf32> -> vector<2x64xf32>
      %c0_19 = arith.constant 0 : index
      %c0_20 = arith.constant 0 : index
      %20 = vector.load %arg3[%c0_19, %c0_20] : memref<64x4xf32, #tpu.memory_space<vmem>>, vector<64x4xf32>
      %c0_21 = arith.constant 0 : index
      %c0_22 = arith.constant 0 : index
      %21 = vector.load %arg4[%c0_21, %c0_22] : memref<4x64xf32, #tpu.memory_space<vmem>>, vector<4x64xf32>
      %cst_23 = arith.constant dense<0.000000e+00> : vector<2x4xf32>
      %22 = tpu.matmul %19, %20, %cst_23 {dimension_numbers = #tpu.dot_dimension_numbers<[1], [0], [0], [1], [0, 0, 1, 1], [], []>} : vector<2x64xf32>, vector<64x4xf32>, vector<2x4xf32> -> vector<2x4xf32>
      %cst_24 = arith.constant 0.000000e+00 : f32
      %23 = vector.broadcast %cst_24 : f32 to vector<2x4xf32>
      %24 = arith.maximumf %22, %23 : vector<2x4xf32>
      %cst_25 = arith.constant dense<0.000000e+00> : vector<2x64xf32>
      %25 = tpu.matmul %24, %21, %cst_25 {dimension_numbers = #tpu.dot_dimension_numbers<[1], [0], [0], [1], [0, 0, 1, 1], [], []>} : vector<2x4xf32>, vector<4x64xf32>, vector<2x64xf32> -> vector<2x64xf32>
      %26 = vector.extract_strided_slice %25 {offsets = [0, 0], sizes = [1, 64], strides = [1, 1]} : vector<2x64xf32> to vector<1x64xf32>
      %27 = vector.extract_strided_slice %25 {offsets = [1, 0], sizes = [1, 64], strides = [1, 1]} : vector<2x64xf32> to vector<1x64xf32>
      %28 = arith.addf %26, %27 : vector<1x64xf32>
      %29 = arith.negf %28 : vector<1x64xf32>
      %30 = math.exp %29 : vector<1x64xf32>
      %cst_26 = arith.constant 1.000000e+00 : f32
      %31 = vector.broadcast %cst_26 : f32 to vector<1x64xf32>
      %32 = arith.addf %31, %30 : vector<1x64xf32>
      %33 = arith.divf %31, %32 : vector<1x64xf32>
      %34 = vector.shape_cast %33 : vector<1x64xf32> to vector<1x1x64xf32>
      %c0_27 = arith.constant 0 : index
      %c0_28 = arith.constant 0 : index
      %c0_29 = arith.constant 0 : index
      %35 = vector.load %arg5[%c0_27, %c0_28, %c0_29] : memref<1x1x64xf32, #tpu.memory_space<vmem>>, vector<1x1x64xf32>
      tpu.vector_store %arg5[%c0_27, %c0_28, %c0_29], %34 {strides = array<i32>} : memref<1x1x64xf32, #tpu.memory_space<vmem>>, vector<1x1x64xf32>,
    } else {
    }
    return
  }
  func.func @transform_0(%arg0: i32, %arg1: i32) -> (i32, i32, i32) {
    %c0_i32 = arith.constant 0 : i32
    %c0_i32_0 = arith.constant 0 : i32
    return %arg0, %c0_i32, %arg1 : i32, i32, i32
  }
  func.func @transform_1(%arg0: i32, %arg1: i32) -> (i32, i32) {
    %c0_i32 = arith.constant 0 : i32
    %c0_i32_0 = arith.constant 0 : i32
    %c0_i32_1 = arith.constant 0 : i32
    return %c0_i32, %c0_i32_0 : i32, i32
  }
  func.func @transform_2(%arg0: i32, %arg1: i32) -> (i32, i32) {
    %c0_i32 = arith.constant 0 : i32
    %c0_i32_0 = arith.constant 0 : i32
    %c0_i32_1 = arith.constant 0 : i32
    return %c0_i32, %c0_i32_0 : i32, i32
  }
  func.func @transform_3(%arg0: i32, %arg1: i32) -> (i32, i32, i32) {
    %c0_i32 = arith.constant 0 : i32
    %c0_i32_0 = arith.constant 0 : i32
    %c0_i32_1 = arith.constant 0 : i32
    return %arg0, %c0_i32, %c0_i32_0 : i32, i32, i32
  }
}

</mosaic_0001>

<bundles_post_ra>
// kernel: tpu_custom_call.1
= control target key start
LH: loop header
LB: loop body
LE: loop exit
PB: predicated region body
PF: predicated region fallthrough
CT: control target
= control target key end

     0   :  { %8 = vsyncpa [#allocation5], 0  ;;  %s1278_s0 = inlined_call_operand.hbm [shape: f32[2,64,256], index: 0, kind: input, shape index: {}]   ;;  %s1279_s1 = inlined_call_operand.vmem [shape: f32[64,4], index: 1, kind: input, shape index: {}]   ;;  %s1280_s2 = inlined_call_operand.vmem [shape: f32[4,64], index: 2, kind: input, shape index: {}]   ;;  %s1281_s3 = inlined_call_operand.hbm [shape: f32[2,1,64], index: 3, kind: output, shape index: {}]  }
   0x1   :  { %10 = vsyncpa [#allocation5 + $0x1], 0 }
   0x2   :  { %11 = vsyncpa [#allocation6], 0 }
   0x3   :  { %13 = vsyncpa [#allocation6 + $0x1], 0  ;;  %s1100_s12 = smov 0   ;;  %s1102_s13 = smov 0  }
   0x4   :  { %s1104_s14 = smov 0   ;;  %s1106_s15 = smov 0  }
   0x5   :  { %s1108_s16 = smov 0   ;;  %s1110_s17 = smov 0  }
   0x6 LB: > { %s870_s18 = sadd.s32 4294967295, %s1073_s17   ;;  %s871_s19 = sadd.s32 4294967294, %s1073_s17   ;;  %s1073_s17 = sphi %s1110_s17, %s19_s17   ;;  %s1069_s16 = sphi %s1108_s16, %s1290_s16   ;;  %s1065_s15 = sphi %s1106_s15, %s1289_s15   ;;  %s1061_s14 = sphi %s1104_s14, %s1288_s14   ;;  %s1057_s13 = sphi %s1102_s13, %s1287_s13   ;;  %s1053_s12 = sphi %s1100_s12, %s1286_s12  }
   0x7   : > { %s31_s20 = sadd.s32 1, %s1069_s16  ;;  %s40_s21 = sadd.s32 1, %s1061_s14 }
   0x8   : > { %p33_p0 = scmp.ge.s32.totalorder %s31_s20, 2  ;;  %p47_p1 = scmp.ne.s32.totalorder %s1061_s14, %s1057_s13 }
   0x9   : > { %p48_p2 = scmp.eq.s32.totalorder %s1073_s17, 0  ;;  %p53_p3 = scmp.ne.s32.totalorder %s1057_s13, %s1053_s12 }
   0xa   : > { %s1292_s20 = smov (%p33_p0, %s31_s20), 0  ;;  %p54_p5 = scmp.eq.s32.totalorder %s870_s18, 0 }
   0xb   : > { %p1141_p4 = por %p48_p2, %p47_p1  ;;  %s35_s23 = ssub.s32 %s1069_s16, %s1292_s20 }
   0xc   : > { %p119_p6 = scmp.eq.s32.totalorder %s870_s18, 1  ;;  %p38_p7 = scmp.eq.s32.totalorder %s35_s23, 0 }
   0xd   : > { %p1147_p8 = por %p54_p5, %p53_p3  ;;  %p125_p10 = scmp.eq.s32.totalorder %s871_s19, 1 }
   0xe   : > { %p1151_p9 = por %p119_p6, %p47_p1  ;;  %p873_p12 = scmp.ge.s32.totalorder %s1073_s17, 2 }
   0xf   : > { %s1156_s26 = scalar_select %p38_p7, %s1061_s14, %s40_s21  }
  0x10   : > { %p1158_p11 = por %p125_p10, %p53_p3  ;;  %p898_p13 = scmp.lt.s32.totalorder %s1073_s17, 2 }
  0x11   : > { %s151_s28 = sand.u32 1, %s1061_s14   ;;  %s885_s30 = sshll.u32 %s1069_s16, 7 }
  0x12   : > { %s874_s29 = sshll.u32 %s151_s28, 7  ;;  %s162_s6 = scalar_lea.hbm %s1278_s0, %s885_s30 }
  0x13   : > { %s155_s7 = scalar_lea.vmem [#allocation4], %s874_s29  ;;  %s163_s9 = sshll.u32 %s162_s6, 4  ;;  %s164_s9 = int_to_ptr.hbm [resolvable:$true] %s163_s9 }
  0x14   : > { %s165_s8 = sshll.u32 %s155_s7, 4  ;;  %p891_p0 = pnand %p898_p13, %p1141_p4  ;;  %s166_s8 = int_to_ptr.vmem [resolvable:$true] %s165_s8 }
  0x15   : > { %p877_p1 = scmp.ge.s32.totalorder %s1073_s17, 1  ;;  %s152_s10 = scalar_lea.sflag [#allocation5], %s151_s28 }
  0x16   : > { %s1075_s11 = smov 256   ;;  %s1076_s18 = smov 16  }
  0x17   : > { %893 = dma.hbm_to_vmem [thread:$0]  (!%p891_p0), %s164_s9, 2048, %s166_s8, %s152_s10, %s1075_s11, %s1075_s11, %s1076_s18  }
  0x18   : > { %p173_p2 = scmp.lt.s32.totalorder %s1073_s17, 3 }
  0x1a   : > { %p174_p3 = pnand %p877_p1, %p173_p2 }
  0x1b   : > { %s1174_s19 = sand.u32 (!%p174_p3), 1, %s1057_s13  }
  0x1c   : > { %177 = sbr.rel (%p174_p3) target bundleno = 813 (0x32d), region = 32  ;;  %s878_s21 = sshll.u32 (!%p174_p3), %s1174_s19, 7 }
  0x1d   : > { %s180_s23 = scalar_lea.sflag (!%p174_p3), [#allocation5], %s1174_s19  ;;  %s183_s29 = scalar_lea.vmem (!%p174_p3), [#allocation4], %s878_s21 }
  0x21   : > { %1044 = dma.done.wait (%p1147_p8), %s180_s23, 2048  }
  0x22   : > { %1046 = vsyncadd (%p1147_p8), %s180_s23, 4294965248  ;;  %v214_v0 = vld [vmem:[%s183_s29] sm:$0xff]  ;;  %v215_v1 = vld [vmem:[%s183_s29 + $0x8] sm:$0xff]  ;;  %v1077_v32 = vmov 0   ;;  %vm211_vm0 = vcmask 516096   ;;  %vm435_vm1 = vcmask 130112   ;;  %s789_s4 = scalar_lea.hbm %s1281_s3, %s1065_s15 }
  0x23   : > { %v231_v2 = vadd.f32 %v215_v1, %v214_v0  ;;  %v218_v3 = vld [vmem:[%s183_s29 + $0x20] sm:$0xff]  ;;  %v219_v4 = vld [vmem:[%s183_s29 + $0x28] sm:$0xff]  ;;  %v216_v8 = vld [vmem:[%s183_s29 + $0x10] sm:$0xff]  ;;  %v466_v24 = vmax.f32 %v214_v0, %v215_v1  ;;  %953 = vset.pattern.permute.xlu1 %v1077_v32  ;;  %954 = vset.pattern.permute.xlu2 %v1077_v32  ;;  %vm439_vm2 = vcmask 195712   ;;  %vm443_vm3 = vcmask 261312   ;;  %s205_s5 = scalar_lea.vmem [#allocation7], %s1174_s19 }
  0x24   : > { %v237_v5 = vadd.f32 %v219_v4, %v218_v3  ;;  %v222_v6 = vld [vmem:[%s183_s29 + $0x40] sm:$0xff]  ;;  %v223_v7 = vld [vmem:[%s183_s29 + $0x48] sm:$0xff]  ;;  %v217_v9 = vld [vmem:[%s183_s29 + $0x18] sm:$0xff]  ;;  %v472_v26 = vmax.f32 %v218_v3, %v219_v4  ;;  %955 = vset.pattern.permute.xlu0 %v1077_v32  ;;  %vm447_vm4 = vcmask 326912   ;;  %vm451_vm5 = vcmask 392512   ;;  %s791_s6 = sshll.u32 %s205_s5, 4  ;;  %s792_s6 = int_to_ptr.vmem [resolvable:$true] %s791_s6 }
  0x25   : > { %232 = vadd.xlane.f32.xlu0 %v231_v2  ;;  %v243_v10 = vadd.f32 %v223_v7, %v222_v6  ;;  %v220_v11 = vld [vmem:[%s183_s29 + $0x30] sm:$0xff]  ;;  %v221_v12 = vld [vmem:[%s183_s29 + $0x38] sm:$0xff]  ;;  %v234_v13 = vadd.f32 %v217_v9, %v216_v8  ;;  %v226_v18 = vld [vmem:[%s183_s29 + $0x60] sm:$0xff]  ;;  %v469_v25 = vmax.f32 %v216_v8, %v217_v9  ;;  %v478_v28 = vmax.f32 %v222_v6, %v223_v7  ;;  %s793_s7 = sshll.u32 %s789_s4, 4  ;;  %s781_s15 = scalar_lea.sflag [#allocation6], %s1174_s19  ;;  %s794_s7 = int_to_ptr.hbm [resolvable:$true] %s793_s7 }
  0x26   : > { %238 = vadd.xlane.f32.xlu1 %v237_v5  ;;  %v224_v14 = vld [vmem:[%s183_s29 + $0x50] sm:$0xff]  ;;  %v225_v15 = vld [vmem:[%s183_s29 + $0x58] sm:$0xff]  ;;  %v240_v16 = vadd.f32 %v221_v12, %v220_v11  ;;  %v227_v19 = vld [vmem:[%s183_s29 + $0x68] sm:$0xff]  ;;  %v475_v27 = vmax.f32 %v220_v11, %v221_v12  ;;  %vm455_vm6 = vcmask 458112   ;;  %vm459_vm7 = vcmask 523712   ;;  %s1005_s8 = sshra.s32 %s794_s7, 4  ;;  %s1006_s8 = int_to_ptr.hbm [resolvable:$true] %s1005_s8 }
  0x27   : > { %244 = vadd.xlane.f32.xlu2 %v243_v10  ;;  %v246_v17 = vadd.f32 %v225_v15, %v224_v14  ;;  %v228_v20 = vld [vmem:[%s183_s29 + $0x70] sm:$0xff]  ;;  %v229_v21 = vld [vmem:[%s183_s29 + $0x78] sm:$0xff]  ;;  %v249_v22 = vadd.f32 %v227_v19, %v226_v18  ;;  %v481_v29 = vmax.f32 %v224_v14, %v225_v15  ;;  %v484_v30 = vmax.f32 %v226_v18, %v227_v19  ;;  %s1007_s9 = scalar_lea.hbm %s1006_s8, 1  ;;  %s1011_s18 = scalar_lea.hbm %s1281_s3, 2 }
  0x28   : > { %v252_v23 = vadd.f32 %v229_v21, %v228_v20  ;;  %v487_v31 = vmax.f32 %v228_v20, %v229_v21  ;;  %vm692_vm8 = vcmask 1040384   ;;  %vm703_vm9 = vcmask 523264   ;;  %p1008_p4 = scmp.ne.s32.totalorder %s1006_s8, %s1007_s9  ;;  %p1012_p7 = scmp.lt.s32.totalorder %s1006_s8, %s1281_s3 }
  0x29   : > { %vm732_vm10 = vcmask 1043456   ;;  %vm728_vm11 = vcmask 31744   ;;  %p1013_p8 = scmp.lt.s32.totalorder %s1011_s18, %s1007_s9 }
  0x2a   : > { %p1009_p5 = pnand %p1008_p4, %p1151_p9 }
  0x2b   : > { %p1014_p10 = por %p1013_p8, %p1012_p7 }
  0x2c   : > { %p1010_p6 = pneg %p1009_p5 }
  0x2d   : > { %235 = vadd.xlane.f32.xlu0 %v234_v13 }
  0x2e   : > { %241 = vadd.xlane.f32.xlu1 %v240_v16  ;;  %p1015_p13 = pnand %p1014_p10, %p1010_p6 }
  0x2f   : > { %247 = vadd.xlane.f32.xlu2 %v246_v17 }
  0x35   : > { %250 = vadd.xlane.f32.xlu0 %v249_v22 }
  0x36   : > { %253 = vadd.xlane.f32.xlu1 %v252_v23 }
  0x37   : > { %467 = vmax.xlane.f32.xlu2 %v466_v24 }
  0x3d   : > { %470 = vmax.xlane.f32.xlu0 %v469_v25 }
  0x3e   : > { %473 = vmax.xlane.f32.xlu1 %v472_v26 }
  0x3f   : > { %476 = vmax.xlane.f32.xlu2 %v475_v27 }
  0x45   : > { %479 = vmax.xlane.f32.xlu0 %v478_v28 }
  0x46   : > { %482 = vmax.xlane.f32.xlu1 %v481_v29 }
  0x47   : > { %485 = vmax.xlane.f32.xlu2 %v484_v30 }
  0x4d   : > { %488 = vmax.xlane.f32.xlu0 %v487_v31 }
  0x98   : > { %v233_v33 = vpop.xlane.xlu0 %232 }
  0x99   : > { %v263_v34 = vperm.slane %v233_v33, 0  ;;  %v264_v35 = vperm.slane %v233_v33, 1  ;;  %v265_v36 = vperm.slane %v233_v33, 2  ;;  %v266_v37 = vperm.slane %v233_v33, 3  ;;  %v239_v52 = vpop.xlane.xlu1 %238 }
  0x9a   : > { %v267_v38 = vperm.slane %v233_v33, 4  ;;  %v268_v39 = vperm.slane %v233_v33, 5  ;;  %v269_v40 = vperm.slane %v233_v33, 6  ;;  %v270_v41 = vperm.slane %v233_v33, 7  ;;  %v245_v8 = vpop.xlane.xlu2 %244 }
  0x9b   : > { %327 = vst [vmem:[#allocation1] ss:$9 sm:$0xff] %v263_v34  ;;  %v279_v53 = vperm.slane %v239_v52, 0  ;;  %v280_v54 = vperm.slane %v239_v52, 1  ;;  %v281_v55 = vperm.slane %v239_v52, 2  ;;  %v282_v57 = vperm.slane %v239_v52, 3 }
  0x9c   : > { %329 = vst [vmem:[#allocation1 + $0x1] ss:$9 sm:$0xff] %v264_v35  ;;  %v283_v58 = vperm.slane %v239_v52, 4  ;;  %v284_v59 = vperm.slane %v239_v52, 5  ;;  %v285_v60 = vperm.slane %v239_v52, 6  ;;  %v286_v61 = vperm.slane %v239_v52, 7 }
  0x9d   : > { %331 = vst [vmem:[#allocation1 + $0x2] ss:$9 sm:$0xff] %v265_v36  ;;  %v295_v9 = vperm.slane %v245_v8, 0  ;;  %v296_v10 = vperm.slane %v245_v8, 1  ;;  %v297_v11 = vperm.slane %v245_v8, 2  ;;  %v298_v13 = vperm.slane %v245_v8, 3 }
  0x9e   : > { %333 = vst [vmem:[#allocation1 + $0x3] ss:$9 sm:$0xff] %v266_v37  ;;  %v299_v14 = vperm.slane %v245_v8, 4  ;;  %v300_v15 = vperm.slane %v245_v8, 5  ;;  %v301_v16 = vperm.slane %v245_v8, 6  ;;  %v302_v17 = vperm.slane %v245_v8, 7 }
  0x9f   : > { %335 = vst [vmem:[#allocation1 + $0x4] ss:$9 sm:$0xff] %v267_v38 }
  0xa0   : > { %337 = vst [vmem:[#allocation1 + $0x5] ss:$9 sm:$0xff] %v268_v39  ;;  %v236_v42 = vpop.xlane.xlu0 %235 }
  0xa1   : > { %339 = vst [vmem:[#allocation1 + $0x6] ss:$9 sm:$0xff] %v269_v40  ;;  %v271_v43 = vperm.slane %v236_v42, 0  ;;  %v272_v44 = vperm.slane %v236_v42, 1  ;;  %v273_v45 = vperm.slane %v236_v42, 2  ;;  %v274_v47 = vperm.slane %v236_v42, 3  ;;  %v242_v62 = vpop.xlane.xlu1 %241 }
  0xa2   : > { %341 = vst [vmem:[#allocation1 + $0x7] ss:$9 sm:$0xff] %v270_v41  ;;  %v275_v48 = vperm.slane %v236_v42, 4  ;;  %v276_v49 = vperm.slane %v236_v42, 5  ;;  %v277_v50 = vperm.slane %v236_v42, 6  ;;  %v278_v51 = vperm.slane %v236_v42, 7  ;;  %v248_v18 = vpop.xlane.xlu2 %247 }
  0xa3   : > { %v287_v63 = vperm.slane %v242_v62, 0  ;;  %v288_v0 = vperm.slane %v242_v62, 1  ;;  %v289_v1 = vperm.slane %v242_v62, 2  ;;  %v290_v3 = vperm.slane %v242_v62, 3 }
  0xa4   : > { %v291_v4 = vperm.slane %v242_v62, 4  ;;  %v292_v5 = vperm.slane %v242_v62, 5  ;;  %v293_v6 = vperm.slane %v242_v62, 6  ;;  %v294_v7 = vperm.slane %v242_v62, 7 }
  0xa5   : > { %v303_v19 = vperm.slane %v248_v18, 0  ;;  %v304_v20 = vperm.slane %v248_v18, 1  ;;  %v305_v21 = vperm.slane %v248_v18, 2  ;;  %v306_v23 = vperm.slane %v248_v18, 3 }
  0xa6   : > { %v307_v24 = vperm.slane %v248_v18, 4  ;;  %v308_v25 = vperm.slane %v248_v18, 5  ;;  %v309_v26 = vperm.slane %v248_v18, 6  ;;  %v310_v27 = vperm.slane %v248_v18, 7 }
  0xa8   : > { %v251_v28 = vpop.xlane.xlu0 %250 }
  0xa9   : > { %v342_v46 = vld [vmem:[#allocation1] sm:$0xff]  ;;  %v311_v29 = vperm.slane %v251_v28, 0  ;;  %v312_v30 = vperm.slane %v251_v28, 1  ;;  %v313_v31 = vperm.slane %v251_v28, 2  ;;  %v314_v33 = vperm.slane %v251_v28, 3  ;;  %v254_v38 = vpop.xlane.xlu1 %253 }
  0xaa   : > { %343 = vst [vmem:[#allocation1] ss:$9 sm:$0xff] %v271_v43  ;;  %407 = vperm.xlu1 %953, %v342_v46   ;;  %v315_v34 = vperm.slane %v251_v28, 4  ;;  %v316_v35 = vperm.slane %v251_v28, 5  ;;  %v317_v36 = vperm.slane %v251_v28, 6  ;;  %v318_v37 = vperm.slane %v251_v28, 7 }
  0xab   : > { %344 = vst [vmem:[#allocation1 + $0x1] ss:$9 sm:$0xff] %v272_v44  ;;  %v319_v39 = vperm.slane %v254_v38, 0  ;;  %v320_v40 = vperm.slane %v254_v38, 1  ;;  %v321_v41 = vperm.slane %v254_v38, 2  ;;  %v322_v43 = vperm.slane %v254_v38, 3 }
  0xac   : > { %345 = vst [vmem:[#allocation1 + $0x2] ss:$9 sm:$0xff] %v273_v45  ;;  %v323_v44 = vperm.slane %v254_v38, 4  ;;  %v324_v45 = vperm.slane %v254_v38, 5  ;;  %v325_v46 = vperm.slane %v254_v38, 6 }
  0xad   : > { %346 = vst [vmem:[#allocation1 + $0x3] ss:$9 sm:$0xff] %v274_v47  ;;  %v326_v47 = vperm.slane %v254_v38, 7 }
  0xae   : > { %347 = vst [vmem:[#allocation1 + $0x4] ss:$9 sm:$0xff] %v275_v48  ;;  %v468_v48 = vpop.xlane.xlu2 %467 }
  0xaf   : > { %348 = vst [vmem:[#allocation1 + $0x5] ss:$9 sm:$0xff] %v276_v49  ;;  %v498_v49 = vperm.slane %v468_v48, 0 }
  0xb0   : > { %349 = vst [vmem:[#allocation1 + $0x6] ss:$9 sm:$0xff] %v277_v50  ;;  %v499_v50 = vperm.slane %v468_v48, 1 }
  0xb1   : > { %350 = vst [vmem:[#allocation1 + $0x7] ss:$9 sm:$0xff] %v278_v51  ;;  %v500_v51 = vperm.slane %v468_v48, 2 }
  0xb8   : > { %v351_v56 = vld [vmem:[#allocation1] sm:$0xff] }
  0xb9   : > { %352 = vst [vmem:[#allocation1] ss:$9 sm:$0xff] %v279_v53  ;;  %410 = vperm.xlu2 %954, %v351_v56   ;;  %v501_v53 = vperm.slane %v468_v48, 3  ;;  %v504_v56 = vperm.slane %v468_v48, 6 }
  0xba   : > { %353 = vst [vmem:[#allocation1 + $0x1] ss:$9 sm:$0xff] %v280_v54  ;;  %v502_v54 = vperm.slane %v468_v48, 4 }
  0xbb   : > { %354 = vst [vmem:[#allocation1 + $0x2] ss:$9 sm:$0xff] %v281_v55  ;;  %v503_v55 = vperm.slane %v468_v48, 5 }
  0xbc   : > { %355 = vst [vmem:[#allocation1 + $0x3] ss:$9 sm:$0xff] %v282_v57  ;;  %v505_v57 = vperm.slane %v468_v48, 7 }
  0xbd   : > { %356 = vst [vmem:[#allocation1 + $0x4] ss:$9 sm:$0xff] %v283_v58  ;;  %v471_v58 = vpop.xlane.xlu0 %470 }
  0xbe   : > { %357 = vst [vmem:[#allocation1 + $0x5] ss:$9 sm:$0xff] %v284_v59  ;;  %v506_v59 = vperm.slane %v471_v58, 0 }
  0xbf   : > { %358 = vst [vmem:[#allocation1 + $0x6] ss:$9 sm:$0xff] %v285_v60  ;;  %v507_v60 = vperm.slane %v471_v58, 1 }
  0xc0   : > { %359 = vst [vmem:[#allocation1 + $0x7] ss:$9 sm:$0xff] %v286_v61  ;;  %v508_v61 = vperm.slane %v471_v58, 2 }
  0xc7   : > { %v360_v2 = vld [vmem:[#allocation1] sm:$0xff] }
  0xc8   : > { %361 = vst [vmem:[#allocation1] ss:$9 sm:$0xff] %v287_v63  ;;  %413 = vperm.xlu1 %953, %v360_v2   ;;  %v509_v63 = vperm.slane %v471_v58, 3  ;;  %v512_v2 = vperm.slane %v471_v58, 6 }
  0xc9   : > { %362 = vst [vmem:[#allocation1 + $0x1] ss:$9 sm:$0xff] %v288_v0  ;;  %v510_v0 = vperm.slane %v471_v58, 4 }
  0xca   : > { %363 = vst [vmem:[#allocation1 + $0x2] ss:$9 sm:$0xff] %v289_v1  ;;  %v511_v1 = vperm.slane %v471_v58, 5 }
  0xcb   : > { %364 = vst [vmem:[#allocation1 + $0x3] ss:$9 sm:$0xff] %v290_v3  ;;  %v513_v3 = vperm.slane %v471_v58, 7 }
  0xcc   : > { %365 = vst [vmem:[#allocation1 + $0x4] ss:$9 sm:$0xff] %v291_v4  ;;  %v474_v4 = vpop.xlane.xlu1 %473 }
  0xcd   : > { %366 = vst [vmem:[#allocation1 + $0x5] ss:$9 sm:$0xff] %v292_v5  ;;  %v514_v5 = vperm.slane %v474_v4, 0 }
  0xce   : > { %367 = vst [vmem:[#allocation1 + $0x6] ss:$9 sm:$0xff] %v293_v6  ;;  %v515_v6 = vperm.slane %v474_v4, 1 }
  0xcf   : > { %368 = vst [vmem:[#allocation1 + $0x7] ss:$9 sm:$0xff] %v294_v7  ;;  %v516_v7 = vperm.slane %v474_v4, 2 }
  0xd6   : > { %v369_v12 = vld [vmem:[#allocation1] sm:$0xff] }
  0xd7   : > { %370 = vst [vmem:[#allocation1] ss:$9 sm:$0xff] %v295_v9  ;;  %416 = vperm.xlu1 %953, %v369_v12   ;;  %v517_v9 = vperm.slane %v474_v4, 3  ;;  %v520_v12 = vperm.slane %v474_v4, 6 }
  0xd8   : > { %371 = vst [vmem:[#allocation1 + $0x1] ss:$9 sm:$0xff] %v296_v10  ;;  %v518_v10 = vperm.slane %v474_v4, 4 }
  0xd9   : > { %372 = vst [vmem:[#allocation1 + $0x2] ss:$9 sm:$0xff] %v297_v11  ;;  %v519_v11 = vperm.slane %v474_v4, 5 }
  0xda   : > { %373 = vst [vmem:[#allocation1 + $0x3] ss:$9 sm:$0xff] %v298_v13  ;;  %v521_v13 = vperm.slane %v474_v4, 7 }
  0xdb   : > { %374 = vst [vmem:[#allocation1 + $0x4] ss:$9 sm:$0xff] %v299_v14  ;;  %v477_v14 = vpop.xlane.xlu2 %476 }
  0xdc   : > { %375 = vst [vmem:[#allocation1 + $0x5] ss:$9 sm:$0xff] %v300_v15  ;;  %v522_v15 = vperm.slane %v477_v14, 0 }
  0xdd   : > { %376 = vst [vmem:[#allocation1 + $0x6] ss:$9 sm:$0xff] %v301_v16  ;;  %v523_v16 = vperm.slane %v477_v14, 1 }
  0xde   : > { %377 = vst [vmem:[#allocation1 + $0x7] ss:$9 sm:$0xff] %v302_v17  ;;  %v524_v17 = vperm.slane %v477_v14, 2 }
  0xe5   : > { %v378_v22 = vld [vmem:[#allocation1] sm:$0xff] }
  0xe6   : > { %379 = vst [vmem:[#allocation1] ss:$9 sm:$0xff] %v303_v19  ;;  %419 = vperm.xlu1 %953, %v378_v22   ;;  %v525_v19 = vperm.slane %v477_v14, 3  ;;  %v528_v22 = vperm.slane %v477_v14, 6 }
  0xe7   : > { %380 = vst [vmem:[#allocation1 + $0x1] ss:$9 sm:$0xff] %v304_v20  ;;  %v526_v20 = vperm.slane %v477_v14, 4 }
  0xe8   : > { %381 = vst [vmem:[#allocation1 + $0x2] ss:$9 sm:$0xff] %v305_v21  ;;  %v527_v21 = vperm.slane %v477_v14, 5 }
  0xe9   : > { %382 = vst [vmem:[#allocation1 + $0x3] ss:$9 sm:$0xff] %v306_v23  ;;  %v529_v23 = vperm.slane %v477_v14, 7 }
  0xea   : > { %383 = vst [vmem:[#allocation1 + $0x4] ss:$9 sm:$0xff] %v307_v24  ;;  %v480_v24 = vpop.xlane.xlu0 %479 }
  0xeb   : > { %384 = vst [vmem:[#allocation1 + $0x5] ss:$9 sm:$0xff] %v308_v25  ;;  %v530_v25 = vperm.slane %v480_v24, 0 }
  0xec   : > { %385 = vst [vmem:[#allocation1 + $0x6] ss:$9 sm:$0xff] %v309_v26  ;;  %v531_v26 = vperm.slane %v480_v24, 1 }
  0xed   : > { %386 = vst [vmem:[#allocation1 + $0x7] ss:$9 sm:$0xff] %v310_v27  ;;  %v532_v27 = vperm.slane %v480_v24, 2 }
  0xf4   : > { %v387_v32 = vld [vmem:[#allocation1] sm:$0xff] }
  0xf5   : > { %388 = vst [vmem:[#allocation1] ss:$9 sm:$0xff] %v311_v29  ;;  %422 = vperm.xlu2 %954, %v387_v32   ;;  %v533_v29 = vperm.slane %v480_v24, 3  ;;  %v536_v32 = vperm.slane %v480_v24, 6 }
  0xf6   : > { %389 = vst [vmem:[#allocation1 + $0x1] ss:$9 sm:$0xff] %v312_v30  ;;  %v534_v30 = vperm.slane %v480_v24, 4 }
  0xf7   : > { %390 = vst [vmem:[#allocation1 + $0x2] ss:$9 sm:$0xff] %v313_v31  ;;  %v535_v31 = vperm.slane %v480_v24, 5 }
  0xf8   : > { %391 = vst [vmem:[#allocation1 + $0x3] ss:$9 sm:$0xff] %v314_v33  ;;  %v537_v33 = vperm.slane %v480_v24, 7 }
  0xf9   : > { %392 = vst [vmem:[#allocation1 + $0x4] ss:$9 sm:$0xff] %v315_v34  ;;  %v483_v34 = vpop.xlane.xlu1 %482 }
  0xfa   : > { %393 = vst [vmem:[#allocation1 + $0x5] ss:$9 sm:$0xff] %v316_v35  ;;  %v538_v35 = vperm.slane %v483_v34, 0  ;;  %v541_v38 = vperm.slane %v483_v34, 3 }
  0xfb   : > { %394 = vst [vmem:[#allocation1 + $0x6] ss:$9 sm:$0xff] %v317_v36  ;;  %v539_v36 = vperm.slane %v483_v34, 1 }
  0xfc   : > { %395 = vst [vmem:[#allocation1 + $0x7] ss:$9 sm:$0xff] %v318_v37  ;;  %v540_v37 = vperm.slane %v483_v34, 2 }
 0x103   : > { %v396_v42 = vld [vmem:[#allocation1] sm:$0xff] }
 0x104   : > { %397 = vst [vmem:[#allocation1] ss:$9 sm:$0xff] %v319_v39  ;;  %425 = vperm.xlu0 %955, %v396_v42   ;;  %v544_v42 = vperm.slane %v483_v34, 6 }
 0x105   : > { %398 = vst [vmem:[#allocation1 + $0x1] ss:$9 sm:$0xff] %v320_v40  ;;  %v542_v40 = vperm.slane %v483_v34, 4 }
 0x106   : > { %399 = vst [vmem:[#allocation1 + $0x2] ss:$9 sm:$0xff] %v321_v41  ;;  %v543_v41 = vperm.slane %v483_v34, 5 }
 0x107   : > { %400 = vst [vmem:[#allocation1 + $0x3] ss:$9 sm:$0xff] %v322_v43  ;;  %v545_v43 = vperm.slane %v483_v34, 7 }
 0x108   : > { %401 = vst [vmem:[#allocation1 + $0x4] ss:$9 sm:$0xff] %v323_v44  ;;  %v486_v44 = vpop.xlane.xlu2 %485 }
 0x109   : > { %402 = vst [vmem:[#allocation1 + $0x5] ss:$9 sm:$0xff] %v324_v45  ;;  %v546_v45 = vperm.slane %v486_v44, 0  ;;  %v549_v48 = vperm.slane %v486_v44, 3 }
 0x10a   : > { %403 = vst [vmem:[#allocation1 + $0x6] ss:$9 sm:$0xff] %v325_v46  ;;  %v547_v46 = vperm.slane %v486_v44, 1 }
 0x10b   : > { %404 = vst [vmem:[#allocation1 + $0x7] ss:$9 sm:$0xff] %v326_v47  ;;  %v548_v47 = vperm.slane %v486_v44, 2 }
 0x112   : > { %v1182_v52 = vld [vmem:[#allocation1] sm:$0xff] }
 0x113   : > { %562 = vst [vmem:[#allocation1] ss:$9 sm:$0xff] %v498_v49 }
 0x114   : > { %564 = vst [vmem:[#allocation1 + $0x1] ss:$9 sm:$0xff] %v499_v50  ;;  %v550_v50 = vperm.slane %v486_v44, 4 }
 0x115   : > { %566 = vst [vmem:[#allocation1 + $0x2] ss:$9 sm:$0xff] %v500_v51  ;;  %v551_v51 = vperm.slane %v486_v44, 5 }
 0x116   : > { %568 = vst [vmem:[#allocation1 + $0x3] ss:$9 sm:$0xff] %v501_v53  ;;  %v552_v53 = vperm.slane %v486_v44, 6 }
 0x117   : > { %570 = vst [vmem:[#allocation1 + $0x4] ss:$9 sm:$0xff] %v502_v54  ;;  %v553_v54 = vperm.slane %v486_v44, 7 }
 0x118   : > { %572 = vst [vmem:[#allocation1 + $0x5] ss:$9 sm:$0xff] %v503_v55  ;;  %v489_v55 = vpop.xlane.xlu0 %488 }
 0x119   : > { %574 = vst [vmem:[#allocation1 + $0x6] ss:$9 sm:$0xff] %v504_v56  ;;  %v554_v56 = vperm.slane %v489_v55, 0  ;;  %v556_v58 = vperm.slane %v489_v55, 2 }
 0x11a   : > { %576 = vst [vmem:[#allocation1 + $0x7] ss:$9 sm:$0xff] %v505_v57  ;;  %v555_v57 = vperm.slane %v489_v55, 1 }
 0x121   : > { %v577_v62 = vld [vmem:[#allocation1] sm:$0xff] }
 0x122   : > { %578 = vst [vmem:[#allocation1] ss:$9 sm:$0xff] %v506_v59  ;;  %642 = vperm.xlu0 %955, %v577_v62   ;;  %v557_v59 = vperm.slane %v489_v55, 3  ;;  %v559_v62 = vperm.slane %v489_v55, 5 }
 0x123   : > { %579 = vst [vmem:[#allocation1 + $0x1] ss:$9 sm:$0xff] %v507_v60 }
 0x124   : > { %580 = vst [vmem:[#allocation1 + $0x2] ss:$9 sm:$0xff] %v508_v61  ;;  %v558_v61 = vperm.slane %v489_v55, 4 }
 0x125   : > { %581 = vst [vmem:[#allocation1 + $0x3] ss:$9 sm:$0xff] %v509_v63  ;;  %v560_v63 = vperm.slane %v489_v55, 6 }
 0x126   : > { %582 = vst [vmem:[#allocation1 + $0x4] ss:$9 sm:$0xff] %v510_v0  ;;  %v561_v0 = vperm.slane %v489_v55, 7 }
 0x127   : > { %583 = vst [vmem:[#allocation1 + $0x5] ss:$9 sm:$0xff] %v511_v1 }
 0x128   : > { %584 = vst [vmem:[#allocation1 + $0x6] ss:$9 sm:$0xff] %v512_v2 }
 0x129   : > { %585 = vst [vmem:[#allocation1 + $0x7] ss:$9 sm:$0xff] %v513_v3  ;;  %v1078_v3 = vmov 0.0  }
 0x12a   : > { %212 = vst.msk [vmem:[#allocation2] sm:$0x1] %vm211_vm0, %v1078_v3 }
 0x130   : > { %v586_v8 = vld [vmem:[#allocation1] sm:$0xff] }
 0x131   : > { %587 = vst [vmem:[#allocation1] ss:$9 sm:$0xff] %v514_v5  ;;  %645 = vperm.xlu2 %954, %v586_v8   ;;  %v411_v5 = vpop.permute.xlu2 %410 }
 0x132   : > { %588 = vst [vmem:[#allocation1 + $0x1] ss:$9 sm:$0xff] %v515_v6  ;;  %v1079_v6 = vmov -inf  }
 0x133   : > { %589 = vst [vmem:[#allocation1 + $0x2] ss:$9 sm:$0xff] %v516_v7  ;;  %v430_v7 = vlaneseq }
 0x134   : > { %590 = vst [vmem:[#allocation1 + $0x3] ss:$9 sm:$0xff] %v517_v9 }
 0x135   : > { %591 = vst [vmem:[#allocation1 + $0x4] ss:$9 sm:$0xff] %v518_v10  ;;  %v431_v10 = vand.u32 127, %v430_v7 }
 0x136   : > { %592 = vst [vmem:[#allocation1 + $0x5] ss:$9 sm:$0xff] %v519_v11 }
 0x137   : > { %593 = vst [vmem:[#allocation1 + $0x6] ss:$9 sm:$0xff] %v520_v12  ;;  %v437_v11 = vadd.s32 4294967280, %v431_v10  ;;  %v433_v12 = vadd.s32 4294967288, %v431_v10  ;;  %v1189_v14 = vadd.s32 4294967264, %v431_v10  ;;  %v453_v24 = vadd.s32 4294967248, %v431_v10 }
 0x138   : > { %594 = vst [vmem:[#allocation1 + $0x7] ss:$9 sm:$0xff] %v521_v13  ;;  %v1187_v13 = vadd.s32 4294967272, %v431_v10 }
 0x139   : > { %213 = vst.msk [vmem:[#allocation3] sm:$0x1] %vm211_vm0, %v1079_v6 }
 0x13f   : > { %v595_v18 = vld [vmem:[#allocation1] sm:$0xff] }
 0x140   : > { %596 = vst [vmem:[#allocation1] ss:$9 sm:$0xff] %v522_v15  ;;  %648 = vperm.xlu2 %954, %v595_v18   ;;  %v701_v15 = vld [vmem:[%s1279_s1 + $0x38] sm:$0xff] }
 0x141   : > { %597 = vst [vmem:[#allocation1 + $0x1] ss:$9 sm:$0xff] %v523_v16  ;;  %715 = vmatpush.msra.mxu0 %v701_v15 }
 0x142   : > { %598 = vst [vmem:[#allocation1 + $0x2] ss:$9 sm:$0xff] %v524_v17 }
 0x143   : > { %599 = vst [vmem:[#allocation1 + $0x3] ss:$9 sm:$0xff] %v525_v19 }
 0x144   : > { %600 = vst [vmem:[#allocation1 + $0x4] ss:$9 sm:$0xff] %v526_v20  ;;  %v700_v20 = vld [vmem:[%s1279_s1 + $0x30] sm:$0xff] }
 0x145   : > { %601 = vst [vmem:[#allocation1 + $0x5] ss:$9 sm:$0xff] %v527_v21  ;;  %v434_v21 = vperm.slane %v411_v5, %v433_v12  ;;  %716 = vmatpush.msra.mxu0 %v700_v20 }
 0x146   : > { %602 = vst [vmem:[#allocation1 + $0x6] ss:$9 sm:$0xff] %v528_v22 }
 0x147   : > { %603 = vst [vmem:[#allocation1 + $0x7] ss:$9 sm:$0xff] %v529_v23 }
 0x14e   : > { %v604_v28 = vld [vmem:[#allocation1] sm:$0xff] }
 0x14f   : > { %605 = vst [vmem:[#allocation1] ss:$9 sm:$0xff] %v530_v25  ;;  %651 = vperm.xlu2 %954, %v604_v28   ;;  %v423_v8 = vpop.permute.xlu2 %422  ;;  %v699_v25 = vld [vmem:[%s1279_s1 + $0x28] sm:$0xff] }
 0x150   : > { %606 = vst [vmem:[#allocation1 + $0x1] ss:$9 sm:$0xff] %v531_v26  ;;  %717 = vmatpush.msra.mxu0 %v699_v25 }
 0x151   : > { %607 = vst [vmem:[#allocation1 + $0x2] ss:$9 sm:$0xff] %v532_v27  ;;  %v449_v27 = vadd.s32 4294967256, %v431_v10 }
 0x152   : > { %608 = vst [vmem:[#allocation1 + $0x3] ss:$9 sm:$0xff] %v533_v29 }
 0x153   : > { %609 = vst [vmem:[#allocation1 + $0x4] ss:$9 sm:$0xff] %v534_v30  ;;  %v698_v30 = vld [vmem:[%s1279_s1 + $0x20] sm:$0xff] }
 0x154   : > { %610 = vst [vmem:[#allocation1 + $0x5] ss:$9 sm:$0xff] %v535_v31  ;;  %v697_v31 = vld [vmem:[%s1279_s1 + $0x18] sm:$0xff]  ;;  %718 = vmatpush.msra.mxu0 %v698_v30 }
 0x155   : > { %611 = vst [vmem:[#allocation1 + $0x6] ss:$9 sm:$0xff] %v536_v32 }
 0x156   : > { %612 = vst [vmem:[#allocation1 + $0x7] ss:$9 sm:$0xff] %v537_v33  ;;  %v457_v33 = vadd.s32 4294967240, %v431_v10  ;;  %719 = vmatpush.msra.mxu0 %v697_v31 }
 0x15d   : > { %v613_v39 = vld [vmem:[#allocation1] sm:$0xff] }
 0x15e   : > { %654 = vperm.xlu0 %955, %v613_v39   ;;  %614 = vst [vmem:[#allocation1] ss:$9 sm:$0xff] %v538_v35  ;;  %v695_v39 = vld [vmem:[%s1279_s1 + $0x8] sm:$0xff] }
 0x15f   : > { %615 = vst [vmem:[#allocation1 + $0x1] ss:$9 sm:$0xff] %v539_v36  ;;  %v696_v36 = vld [vmem:[%s1279_s1 + $0x10] sm:$0xff] }
 0x160   : > { %616 = vst [vmem:[#allocation1 + $0x2] ss:$9 sm:$0xff] %v540_v37  ;;  %v450_v37 = vperm.slane %v423_v8, %v449_v27  ;;  %720 = vmatpush.msra.mxu0 %v696_v36 }
 0x161   : > { %617 = vst [vmem:[#allocation1 + $0x3] ss:$9 sm:$0xff] %v541_v38 }
 0x162   : > { %618 = vst [vmem:[#allocation1 + $0x4] ss:$9 sm:$0xff] %v542_v40  ;;  %721 = vmatpush.msra.mxu0 %v695_v39 }
 0x163   : > { %619 = vst [vmem:[#allocation1 + $0x5] ss:$9 sm:$0xff] %v543_v41 }
 0x164   : > { %620 = vst [vmem:[#allocation1 + $0x6] ss:$9 sm:$0xff] %v544_v42  ;;  %v230_v42 = vld [vmem:[#allocation2] sm:$0x1] }
 0x165   : > { %621 = vst [vmem:[#allocation1 + $0x7] ss:$9 sm:$0xff] %v545_v43 }
 0x16c   : > { %v622_v49 = vld [vmem:[#allocation1] sm:$0xff] }
 0x16d   : > { %657 = vperm.xlu1 %953, %v622_v49   ;;  %623 = vst [vmem:[#allocation1] ss:$9 sm:$0xff] %v546_v45  ;;  %v694_v45 = vld [vmem:[%s1279_s1] sm:$0xff] }
 0x16e   : > { %624 = vst [vmem:[#allocation1 + $0x1] ss:$9 sm:$0xff] %v547_v46  ;;  %722 = vmatpush.msra.mxu0 %v694_v45 }
 0x16f   : > { %625 = vst [vmem:[#allocation1 + $0x2] ss:$9 sm:$0xff] %v548_v47 }
 0x170   : > { %626 = vst [vmem:[#allocation1 + $0x3] ss:$9 sm:$0xff] %v549_v48 }
 0x171   : > { %627 = vst [vmem:[#allocation1 + $0x4] ss:$9 sm:$0xff] %v550_v50 }
 0x172   : > { %628 = vst [vmem:[#allocation1 + $0x5] ss:$9 sm:$0xff] %v551_v51 }
 0x173   : > { %629 = vst [vmem:[#allocation1 + $0x6] ss:$9 sm:$0xff] %v552_v53 }
 0x174   : > { %630 = vst [vmem:[#allocation1 + $0x7] ss:$9 sm:$0xff] %v553_v54 }
 0x175   : > { %428 = vperm.xlu1 %953, %v1182_v52   ;;  %v408_v52 = vpop.permute.xlu1 %407 }
 0x176   : > { %v432_v16 = vperm.slane %v408_v52, %v431_v10  ;;  %v426_v28 = vpop.permute.xlu0 %425  ;;  %v465_v52 = vld [vmem:[#allocation3] sm:$0x1] }
 0x177   : > { %v454_v35 = vperm.slane %v426_v28, %v453_v24 }
 0x178   : > { %v436_v26 = vsel %vm435_vm1, %v434_v21, %v432_v16 }
 0x17b   : > { %v631_v60 = vld [vmem:[#allocation1] sm:$0xff] }
 0x17c   : > { %660 = vperm.xlu2 %954, %v631_v60   ;;  %632 = vst [vmem:[#allocation1] ss:$9 sm:$0xff] %v554_v56 }
 0x17d   : > { %633 = vst [vmem:[#allocation1 + $0x1] ss:$9 sm:$0xff] %v555_v57  ;;  %v414_v2 = vpop.permute.xlu1 %413 }
 0x17e   : > { %634 = vst [vmem:[#allocation1 + $0x2] ss:$9 sm:$0xff] %v556_v58  ;;  %v438_v18 = vperm.slane %v414_v2, %v437_v11 }
 0x17f   : > { %635 = vst [vmem:[#allocation1 + $0x3] ss:$9 sm:$0xff] %v557_v59 }
 0x180   : > { %636 = vst [vmem:[#allocation1 + $0x4] ss:$9 sm:$0xff] %v558_v61  ;;  %v440_v29 = vsel %vm439_vm2, %v438_v18, %v436_v26 }
 0x181   : > { %637 = vst [vmem:[#allocation1 + $0x5] ss:$9 sm:$0xff] %v559_v62 }
 0x182   : > { %638 = vst [vmem:[#allocation1 + $0x6] ss:$9 sm:$0xff] %v560_v63 }
 0x183   : > { %639 = vst [vmem:[#allocation1 + $0x7] ss:$9 sm:$0xff] %v561_v0 }
 0x185   : > { %v417_v4 = vpop.permute.xlu1 %416 }
 0x186   : > { %v442_v22 = vperm.slane %v417_v4, %v1187_v13 }
 0x188   : > { %v444_v32 = vsel %vm443_vm3, %v442_v22, %v440_v29 }
 0x18a   : > { %v640_v1 = vld [vmem:[#allocation1] sm:$0xff] }
 0x18b   : > { %663 = vperm.xlu0 %955, %v640_v1   ;;  %v646_v17 = vpop.permute.xlu2 %645 }
 0x18c   : > { %v666_v50 = vperm.slane %v646_v17, %v433_v12 }
 0x18d   : > { %v420_v9 = vpop.permute.xlu1 %419 }
 0x18e   : > { %v446_v23 = vperm.slane %v420_v9, %v1189_v14 }
 0x190   : > { %v448_v34 = vsel %vm447_vm4, %v446_v23, %v444_v32 }
 0x191   : > { %v452_v40 = vsel %vm451_vm5, %v450_v37, %v448_v34 }
 0x192   : > { %v456_v44 = vsel %vm455_vm6, %v454_v35, %v452_v40 }
 0x194   : > { %v643_v48 = vpop.permute.xlu0 %642 }
 0x195   : > { %v665_v49 = vperm.slane %v643_v48, %v431_v10  ;;  %v702_v10 = vld [vmem:[%s1280_s2] sm:$0xf] }
 0x196   : > { %880 = vmatpush.msk.msra.mxu1 %vm732_vm10, %v702_v10 }
 0x197   : > { %v667_v53 = vsel %vm435_vm1, %v666_v50, %v665_v49 }
 0x19a   : > { %v649_v41 = vpop.permute.xlu2 %648 }
 0x19b   : > { %v668_v55 = vperm.slane %v649_v41, %v437_v11 }
 0x19d   : > { %v669_v56 = vsel %vm439_vm2, %v668_v55, %v667_v53 }
 0x1a9   : > { %v652_v51 = vpop.permute.xlu2 %651 }
 0x1aa   : > { %v670_v58 = vperm.slane %v652_v51, %v1187_v13 }
 0x1ac   : > { %v671_v61 = vsel %vm443_vm3, %v670_v58, %v669_v56 }
 0x1d0   : > { %v655_v54 = vpop.permute.xlu0 %654 }
 0x1d1   : > { %v672_v57 = vperm.slane %v655_v54, %v1189_v14 }
 0x1d3   : > { %v673_v62 = vsel %vm447_vm4, %v672_v57, %v671_v61 }
 0x1d6   : > { %v661_v60 = vpop.permute.xlu2 %660 }
 0x1d7   : > { %v676_v0 = vperm.slane %v661_v60, %v453_v24 }
 0x1df   : > { %v658_v19 = vpop.permute.xlu1 %657 }
 0x1e0   : > { %v674_v59 = vperm.slane %v658_v19, %v449_v27 }
 0x1e2   : > { %v675_v63 = vsel %vm451_vm5, %v674_v59, %v673_v62 }
 0x1e3   : > { %v677_v3 = vsel %vm455_vm6, %v676_v0, %v675_v63 }
 0x1e7   : > { %v429_v38 = vpop.permute.xlu1 %428 }
 0x1e8   : > { %v458_v43 = vperm.slane %v429_v38, %v457_v33 }
 0x1ea   : > { %v460_v46 = vsel %vm459_vm7, %v458_v43, %v456_v44 }
 0x1eb   : > { %v462_v47 = vadd.f32 %v460_v46, %v230_v42 }
 0x1ed   : > { %464 = vst.msk [vmem:[#allocation2] sm:$0x1] %vm211_vm0, %v462_v47 }
 0x1f4   : > { %v686_v6 = vld [vmem:[#allocation2] sm:$0x1] }
 0x1f5   : > { %v687_v7 = vmul.f32 0.00390625, %v686_v6 }
 0x1fd   : > { %v664_v1 = vpop.permute.xlu0 %663 }
 0x1fe   : > { %v678_v2 = vperm.slane %v664_v1, %v457_v33 }
 0x200   : > { %v679_v4 = vsel %vm459_vm7, %v678_v2, %v677_v3 }
 0x201   : > { %v681_v5 = vmax.f32 %v465_v52, %v679_v4 }
 0x203   : > { %682 = vst.msk [vmem:[#allocation3] sm:$0x1] %vm211_vm0, %v681_v5 }
 0x20a   : > { %v956_v8 = vld [vmem:[#allocation3] ss:$0 sm:$0xff] }
 0x20b   : > { %v693_v9 = vsel %vm692_vm8, %v687_v7, %v956_v8 }
 0x20c   : > { %879 = vmatmul.msk.f32.vlgmr.msra.gmra.mxu0 %vm703_vm9, %v693_v9 }
 0x289   : > { %v724_v11 = vpop.f32.mrf.mxu0 }
 0x28a   : > { %v727_v12 = vmax.f32 %v724_v11, 0.0 }
 0x28c   : > { %881 = vmatmul.msk.f32.vlgmr.msra.gmra.mxu1 %vm728_vm11, %v727_v12 }
 0x309   : > { %v753_v13 = vpop.f32.mrf.mxu1 }
 0x30a   : > { %v757_v14 = vrot.slane %v753_v13, 1 }
 0x30c   : > { %v759_v15 = vadd.f32 %v757_v14, %v753_v13 }
 0x30e   : > { %v882_v16 = vmul.f32 -1.442695, %v759_v15 }
 0x310   : > { %957 = vpow2.f32 %v882_v16 }
 0x316   : > { %v958_v17 = vpop.eup %957 }
 0x317   : > { %v763_v18 = vadd.f32 1.0, %v958_v17 }
 0x319   : > { %959 = vrcp.f32 %v763_v18  ;;  %v775_v22 = vand.u32 2147483648, %v763_v18  ;;  %v773_v24 = vand.u32 2147483647, %v763_v18  ;;  %vm769_vm13 = vweird.f32 %v763_v18 }
 0x31b   : > { %v776_v26 = vor.u32 1.1754944e-38, %v775_v22  ;;  %vm774_vm15 = vcmp.eq.f32.partialorder %v773_v24, 8.507059e+37 }
 0x31f   : > { %v960_v19 = vpop.eup %959 }
 0x320   : > { %v765_v20 = vmul.f32 %v960_v19, %v763_v18  ;;  %vm770_vm12 = vweird.f32 %v960_v19 }
 0x321   : > { %vm771_vm14 = vmor %vm769_vm13, %vm770_vm12 }
 0x322   : > { %v766_v21 = vsub.f32 1.0, %v765_v20 }
 0x324   : > { %v767_v23 = vmul.f32 %v960_v19, %v766_v21 }
 0x326   : > { %v768_v25 = vadd.f32 %v960_v19, %v767_v23 }
 0x328   : > { %v772_v27 = vsel %vm771_vm14, %v960_v19, %v768_v25 }
 0x329   : > { %v777_v28 = vsel %vm774_vm15, %v776_v26, %v772_v27 }
 0x32a   : > { %779 = vst.msk [vmem:[%s205_s5] sm:$0x1] %vm211_vm0, %v777_v28 }
 0x32b   : > { %1018 = shalt.err (!%p1015_p13)
}
 0x32c   : > { %888 = dma.vmem_to_hbm [thread:$0]  (%p1151_p9), %s792_s6, 16, %s794_s7, %s781_s15  }
 0x32d PF: > { %s805_s19 = sand.u32 1, %s1053_s12   ;;  %p895_p0 = pnand %p873_p12, %p1158_p11 }
 0x32e   : > { %s806_s29 = scalar_lea.sflag [#allocation6], %s805_s19 }
 0x32f   : > { %p896_p1 = pneg %p895_p0 }
 0x331   : > { %1048 = dma.done.wait (%p896_p1), %s806_s29, 16  }
 0x332   : > { %1050 = vsyncadd (%p896_p1), %s806_s29, 4294967280  ;;  %s19_s17 = sadd.s32 1, %s1073_s17   ;;  %s1286_s12 = smov %s1057_s13 }
 0x333   : > { %p16_p2 = scmp.ge.s32.totalorder %s19_s17, 4   ;;  %s1287_s13 = smov %s1061_s14 }
 0x334   : > { %s1288_s14 = smov %s1156_s26  ;;  %s1289_s15 = smov %s1069_s16 }
 0x335   : > { %s1290_s16 = smov %s1292_s20  ;;  %18 = sbr.rel (!%p16_p2) target bundleno = 6 (0x6), region = 99 }
 0x33a   :  { %811 = vsyncpa [#allocation5], 1 }
 0x33b   :  { %813 = vsyncpa [#allocation5 + $0x1], 1 }
 0x33c   :  { %814 = vsyncpa [#allocation6], 1 }
 0x33d   :  { %816 = vsyncpa [#allocation6 + $0x1], 1 }

</bundles_post_ra>
